<compile_context>
chip_gen: v6e
topology: v6e:2x2x1
jax: 0.10.0
libtpu: 0.0.40
codegen_flags: <defaults>
</compile_context>

<pallas_src>
import numpy as np
import jax
import jax.numpy as jnp
from jax.experimental import pallas as pl
from jax.experimental.pallas import tpu as pltpu


# ---------------------------------------------------------------------------
# helpers (plain JAX / numpy glue)
# ---------------------------------------------------------------------------
def _adaptive_pool_matrix(l_in: int, l_out: int) -> np.ndarray:
    """(l_in, l_out) matrix P such that  x @ P == torch.nn.AdaptiveAvgPool1d(l_out)(x)."""
    P = np.zeros((l_in, l_out), dtype=np.float32)
    for i in range(l_out):
        s = (i * l_in) // l_out
        e = -((-(i + 1) * l_in) // l_out)  # ceil((i+1)*l_in / l_out)
        P[s:e, i] = 1.0 / float(e - s)
    return P


def init_params(key, C_in, C_out, K, GF_out, GC, GD):
    """Deterministic PyTorch-default-style init (uniform +/- 1/sqrt(fan_in))."""
    O2 = 2 * C_out
    F = O2 * GF_out
    keys = jax.random.split(key, 12)

    def u(k, shape, fan_in):
        b = 1.0 / float(np.sqrt(fan_in))
        return jax.random.uniform(k, shape, jnp.float32, -b, b)

    return dict(
        w1=u(keys[0], (C_out, C_in, K), C_in * K),   # Conv1d #1 weight (O, I, K)
        b1=u(keys[1], (C_out,), C_in * K),
        w2=u(keys[2], (O2, C_out, K), C_out * K),    # Conv1d #2 weight (O, I, K)
        b2=u(keys[3], (O2,), C_out * K),
        wc1=u(keys[4], (F, F), F), bc1=u(keys[5], (F,), F),     # GC linear 1
        wc2=u(keys[6], (GC, F), F), bc2=u(keys[7], (GC,), F),   # GC linear 2
        wd1=u(keys[8], (F, F), F), bd1=u(keys[9], (F,), F),     # GD linear 1
        wd2=u(keys[10], (GD, F), F), bd2=u(keys[11], (GD,), F), # GD linear 2
    )


# ---------------------------------------------------------------------------
# fused Pallas kernel (conv1 -> pool1 -> conv2 -> pool2 -> flatten -> heads)
# ---------------------------------------------------------------------------
def _make_fused_kernel(K: int, GF_out: int, B: int):
    def kernel(x1_ref, w1_ref, b1_ref, pq_ref, w2_ref, b2_ref, pool2_ref,
               w1h_ref, b1h_ref, w2h_ref, b2h_ref, out_ref):
        f32 = jnp.float32

        # Conv1d #1 (im2col'd, batch folded into lanes) + bias + ReLU: (C_out, B*L1)
        y1 = jnp.dot(w1_ref[...], x1_ref[...], preferred_element_type=f32)
        y1 = jnp.maximum(y1 + b1_ref[...], 0.0)

        # AdaptiveAvgPool1d(3*GF_out) + Conv1d #2: pool and per-tap shift are
        # folded into precomputed block-diagonal PQ_k matrices.
        z = jnp.dot(w2_ref[0],
                    jnp.dot(y1, pq_ref[0], preferred_element_type=f32),
                    preferred_element_type=f32)
        for k in range(1, K):
            z = z + jnp.dot(w2_ref[k],
                            jnp.dot(y1, pq_ref[k], preferred_element_type=f32),
                            preferred_element_type=f32)
        z = jnp.maximum(z + b2_ref[...], 0.0)                      # (2*C_out, B*L2)

        # AdaptiveAvgPool1d(GF_out); columns ordered (g, b) so the subsequent
        # torch.flatten(x, 1) needs no data movement.
        pooled = jnp.dot(z, pool2_ref[...], preferred_element_type=f32)  # (O2, GF_out*B)

        # Fused GC|GD first linear (hidden = 2*F), feature-major layout.
        h = jnp.dot(w1h_ref[0], pooled[:, 0:B], preferred_element_type=f32)
        for g in range(1, GF_out):
            h = h + jnp.dot(w1h_ref[g], pooled[:, g * B:(g + 1) * B],
                            preferred_element_type=f32)
        h = jnp.maximum(h + b1h_ref[...], 0.0)                     # (2*F, B)

        # Fused GC|GD second linear (block-diagonal weight): (GC+GD, B)
        out_ref[...] = (jnp.dot(w2h_ref[...], h, preferred_element_type=f32)
                        + b2h_ref[...])

    return kernel


# ---------------------------------------------------------------------------
# wrapper (forward pass)
# ---------------------------------------------------------------------------
def wiki_eve_forward(params, x, *, C_in, C_out, K, S, GF_out, GC, GD):
    B, xc, L = x.shape
    assert xc == C_in
    L1 = (L - K) // S + 1
    P1w = 3 * GF_out
    L2 = (P1w - K) // S + 1
    O2 = 2 * C_out
    F = O2 * GF_out
    H2 = 2 * F

    P1 = _adaptive_pool_matrix(L1, P1w)       # (L1, 3*GF_out)
    P2 = _adaptive_pool_matrix(L2, GF_out)    # (L2, GF_out)

    # --- conv1 operands: im2col of the input (wrapper glue), rows (c_in, k),
    #     columns (b, i) so batch lands on the lane (N) axis of the matmul.
    taps = [x[:, :, k: k + (L1 - 1) * S + 1: S] for k in range(K)]   # each (B, C_in, L1)
    x_sl = jnp.stack(taps, axis=2)                                   # (B, C_in, K, L1)
    x1im = jnp.transpose(x_sl, (1, 2, 0, 3)).reshape(C_in * K, B * L1)
    w1 = params["w1"].reshape(C_out, C_in * K)
    b1 = params["b1"].reshape(C_out, 1)

    # --- conv2 operands: pool1 + tap-k shift folded into PQ_k (block-diag over B).
    pq = np.stack([np.kron(np.eye(B, dtype=np.float32),
                           P1[:, k: k + (L2 - 1) * S + 1: S])
                   for k in range(K)]).astype(np.float32)            # (K, B*L1, B*L2)
    w2 = jnp.transpose(params["w2"], (2, 0, 1))                      # (K, O2, C_out)
    b2 = params["b2"].reshape(O2, 1)

    # --- pool2 matrix with columns ordered (g, b): pool2[b*L2+j, g*B+b] = P2[j, g].
    pool2 = np.zeros((B * L2, GF_out * B), np.float32)
    for b in range(B):
        pool2[b * L2:(b + 1) * L2, b::B] = P2

    # --- fused heads: W1cat = [Wc1; Wd1] split per-g to absorb the flatten order,
    #     W2 block-diagonal so GC and GD share one matmul each layer.
    w1cat = jnp.concatenate([params["wc1"], params["wd1"]], axis=0)  # (2F, F)
    w1h = jnp.transpose(w1cat.reshape(H2, O2, GF_out), (2, 0, 1))    # (GF_out, 2F, O2)
    b1h = jnp.concatenate([params["bc1"], params["bd1"]]).reshape(H2, 1)
    w2h = jnp.zeros((GC + GD, H2), jnp.float32)
    w2h = w2h.at[:GC, :F].set(params["wc2"]).at[GC:, F:].set(params["wd2"])
    b2h = jnp.concatenate([params["bc2"], params["bd2"]]).reshape(GC + GD, 1)

    kernel = _make_fused_kernel(K, GF_out, B)
    n_in = 11
    vmem_spec = pl.BlockSpec(memory_space=pltpu.MemorySpace.VMEM)
    out_t = pl.pallas_call(
        kernel,
        out_shape=jax.ShapeDtypeStruct((GC + GD, B), jnp.float32),
        in_specs=[vmem_spec] * n_in,
        out_specs=vmem_spec,
    )(x1im, w1, b1, jnp.asarray(pq), w2, b2, jnp.asarray(pool2),
      w1h, b1h, w2h, b2h)

    out = out_t.T                       # (B, GC+GD) -- trivial XLA transpose
    return out[:, :GC], out[:, GC:]


# ---------------------------------------------------------------------------
# pure-JAX reference for correctness checking
# ---------------------------------------------------------------------------
def reference_forward(params, x, *, K, S, GF_out):
    def conv1d(x, w, b):
        y = jax.lax.conv_general_dilated(
            x, w, window_strides=(S,), padding="VALID",
            dimension_numbers=("NCH", "OIH", "NCH"))
        return y + b[None, :, None]

    def adaptive_pool(x, lout):
        P = jnp.asarray(_adaptive_pool_matrix(x.shape[-1], lout))
        return jnp.einsum("bct,tp->bcp", x, P)

    with jax.default_matmul_precision("highest"):
        y = jax.nn.relu(conv1d(x, params["w1"], params["b1"]))
        y = adaptive_pool(y, 3 * GF_out)
        y = jax.nn.relu(conv1d(y, params["w2"], params["b2"]))
        y = adaptive_pool(y, GF_out)
        f = y.reshape(y.shape[0], -1)
        hc = jax.nn.relu(f @ params["wc1"].T + params["bc1"])
        gc = hc @ params["wc2"].T + params["bc2"]
        hd = jax.nn.relu(f @ params["wd1"].T + params["bd1"])
        gd = hd @ params["wd2"].T + params["bd2"]
    return gc, gd


# ---------------------------------------------------------------------------
if __name__ == "__main__":
    # Small, forward-consistent hyperparameters. L=66 -> L1=64 so the dominant
    # matmul lane dim (B*L1) is exactly 128 (lane-dense, unmasked stores).
    C_in, C_out, K, S = 4, 8, 3, 1
    GF_out, GC, GD = 4, 5, 3
    B, L = 2, 66

    key = jax.random.PRNGKey(0)
    pkey, xkey = jax.random.split(key)
    params = init_params(pkey, C_in, C_out, K, GF_out, GC, GD)
    x = jax.random.normal(xkey, (B, C_in, L), dtype=jnp.float32)

    fwd = jax.jit(wiki_eve_forward,
                  static_argnames=("C_in", "C_out", "K", "S", "GF_out", "GC", "GD"))
    gc, gd = fwd(params, x, C_in=C_in, C_out=C_out, K=K, S=S,
                 GF_out=GF_out, GC=GC, GD=GD)
    jax.block_until_ready((gc, gd))
    assert gc.shape == (B, GC) and gd.shape == (B, GD)

    gc_ref, gd_ref = reference_forward(params, x, K=K, S=S, GF_out=GF_out)
    np.testing.assert_allclose(np.asarray(gc), np.asarray(gc_ref), rtol=2e-3, atol=2e-3)
    np.testing.assert_allclose(np.asarray(gd), np.asarray(gd_ref), rtol=2e-3, atol=2e-3)

    print("KERNEL_OK")
</pallas_src>

<mosaic_0001>
module attributes {stable_mosaic.version = 11 : i64} {
  func.func @kernel(%arg0: memref<12x128xf32, #tpu.memory_space<vmem>>, %arg1: memref<8x12xf32, #tpu.memory_space<vmem>>, %arg2: memref<8x1xf32, #tpu.memory_space<vmem>>, %arg3: memref<3x128x20xf32, #tpu.memory_space<vmem>>, %arg4: memref<3x16x8xf32, #tpu.memory_space<vmem>>, %arg5: memref<16x1xf32, #tpu.memory_space<vmem>>, %arg6: memref<20x8xf32, #tpu.memory_space<vmem>>, %arg7: memref<4x128x16xf32, #tpu.memory_space<vmem>>, %arg8: memref<128x1xf32, #tpu.memory_space<vmem>>, %arg9: memref<8x128xf32, #tpu.memory_space<vmem>>, %arg10: memref<8x1xf32, #tpu.memory_space<vmem>>, %arg11: memref<8x2xf32, #tpu.memory_space<vmem>>) attributes {dimension_semantics = [], scalar_prefetch = 0 : i64, scratch_operands = 0 : i64, tpu.core_type = #tpu.core_type<tc>} {
    %c0 = arith.constant 0 : index
    %c0_0 = arith.constant 0 : index
    %0 = vector.load %arg1[%c0, %c0_0] : memref<8x12xf32, #tpu.memory_space<vmem>>, vector<8x12xf32>
    %c0_1 = arith.constant 0 : index
    %c0_2 = arith.constant 0 : index
    %1 = vector.load %arg0[%c0_1, %c0_2] : memref<12x128xf32, #tpu.memory_space<vmem>>, vector<12x128xf32>
    %cst = arith.constant dense<0.000000e+00> : vector<8x128xf32>
    %2 = tpu.matmul %0, %1, %cst {dimension_numbers = #tpu.dot_dimension_numbers<[1], [0], [0], [1], [0, 0, 1, 1], [], []>} : vector<8x12xf32>, vector<12x128xf32>, vector<8x128xf32> -> vector<8x128xf32>
    %c0_3 = arith.constant 0 : index
    %c0_4 = arith.constant 0 : index
    %3 = vector.load %arg2[%c0_3, %c0_4] : memref<8x1xf32, #tpu.memory_space<vmem>>, vector<8x1xf32>
    %4 = vector.broadcast %3 : vector<8x1xf32> to vector<8x128xf32>
    %5 = arith.addf %2, %4 : vector<8x128xf32>
    %cst_5 = arith.constant 0.000000e+00 : f32
    %6 = vector.broadcast %cst_5 : f32 to vector<8x128xf32>
    %7 = arith.maximumf %5, %6 : vector<8x128xf32>
    %c0_6 = arith.constant 0 : index
    %c0_7 = arith.constant 0 : index
    %c0_8 = arith.constant 0 : index
    %8 = vector.load %arg4[%c0_6, %c0_7, %c0_8] : memref<3x16x8xf32, #tpu.memory_space<vmem>>, vector<1x16x8xf32>
    %9 = vector.shape_cast %8 : vector<1x16x8xf32> to vector<16x8xf32>
    %c0_9 = arith.constant 0 : index
    %c0_10 = arith.constant 0 : index
    %c0_11 = arith.constant 0 : index
    %10 = vector.load %arg3[%c0_9, %c0_10, %c0_11] : memref<3x128x20xf32, #tpu.memory_space<vmem>>, vector<1x128x20xf32>
    %11 = vector.shape_cast %10 : vector<1x128x20xf32> to vector<128x20xf32>
    %cst_12 = arith.constant dense<0.000000e+00> : vector<8x20xf32>
    %12 = tpu.matmul %7, %11, %cst_12 {dimension_numbers = #tpu.dot_dimension_numbers<[1], [0], [0], [1], [0, 0, 1, 1], [], []>} : vector<8x128xf32>, vector<128x20xf32>, vector<8x20xf32> -> vector<8x20xf32>
    %cst_13 = arith.constant dense<0.000000e+00> : vector<16x20xf32>
    %13 = tpu.matmul %9, %12, %cst_13 {dimension_numbers = #tpu.dot_dimension_numbers<[1], [0], [0], [1], [0, 0, 1, 1], [], []>} : vector<16x8xf32>, vector<8x20xf32>, vector<16x20xf32> -> vector<16x20xf32>
    %c1 = arith.constant 1 : index
    %c0_14 = arith.constant 0 : index
    %c0_15 = arith.constant 0 : index
    %14 = vector.load %arg4[%c1, %c0_14, %c0_15] : memref<3x16x8xf32, #tpu.memory_space<vmem>>, vector<1x16x8xf32>
    %15 = vector.shape_cast %14 : vector<1x16x8xf32> to vector<16x8xf32>
    %c1_16 = arith.constant 1 : index
    %c0_17 = arith.constant 0 : index
    %c0_18 = arith.constant 0 : index
    %16 = vector.load %arg3[%c1_16, %c0_17, %c0_18] : memref<3x128x20xf32, #tpu.memory_space<vmem>>, vector<1x128x20xf32>
    %17 = vector.shape_cast %16 : vector<1x128x20xf32> to vector<128x20xf32>
    %cst_19 = arith.constant dense<0.000000e+00> : vector<8x20xf32>
    %18 = tpu.matmul %7, %17, %cst_19 {dimension_numbers = #tpu.dot_dimension_numbers<[1], [0], [0], [1], [0, 0, 1, 1], [], []>} : vector<8x128xf32>, vector<128x20xf32>, vector<8x20xf32> -> vector<8x20xf32>
    %cst_20 = arith.constant dense<0.000000e+00> : vector<16x20xf32>
    %19 = tpu.matmul %15, %18, %cst_20 {dimension_numbers = #tpu.dot_dimension_numbers<[1], [0], [0], [1], [0, 0, 1, 1], [], []>} : vector<16x8xf32>, vector<8x20xf32>, vector<16x20xf32> -> vector<16x20xf32>
    %20 = arith.addf %13, %19 : vector<16x20xf32>
    %c2 = arith.constant 2 : index
    %c0_21 = arith.constant 0 : index
    %c0_22 = arith.constant 0 : index
    %21 = vector.load %arg4[%c2, %c0_21, %c0_22] : memref<3x16x8xf32, #tpu.memory_space<vmem>>, vector<1x16x8xf32>
    %22 = vector.shape_cast %21 : vector<1x16x8xf32> to vector<16x8xf32>
    %c2_23 = arith.constant 2 : index
    %c0_24 = arith.constant 0 : index
    %c0_25 = arith.constant 0 : index
    %23 = vector.load %arg3[%c2_23, %c0_24, %c0_25] : memref<3x128x20xf32, #tpu.memory_space<vmem>>, vector<1x128x20xf32>
    %24 = vector.shape_cast %23 : vector<1x128x20xf32> to vector<128x20xf32>
    %cst_26 = arith.constant dense<0.000000e+00> : vector<8x20xf32>
    %25 = tpu.matmul %7, %24, %cst_26 {dimension_numbers = #tpu.dot_dimension_numbers<[1], [0], [0], [1], [0, 0, 1, 1], [], []>} : vector<8x128xf32>, vector<128x20xf32>, vector<8x20xf32> -> vector<8x20xf32>
    %cst_27 = arith.constant dense<0.000000e+00> : vector<16x20xf32>
    %26 = tpu.matmul %22, %25, %cst_27 {dimension_numbers = #tpu.dot_dimension_numbers<[1], [0], [0], [1], [0, 0, 1, 1], [], []>} : vector<16x8xf32>, vector<8x20xf32>, vector<16x20xf32> -> vector<16x20xf32>
    %27 = arith.addf %20, %26 : vector<16x20xf32>
    %c0_28 = arith.constant 0 : index
    %c0_29 = arith.constant 0 : index
    %28 = vector.load %arg5[%c0_28, %c0_29] : memref<16x1xf32, #tpu.memory_space<vmem>>, vector<16x1xf32>
    %29 = vector.broadcast %28 : vector<16x1xf32> to vector<16x20xf32>
    %30 = arith.addf %27, %29 : vector<16x20xf32>
    %cst_30 = arith.constant 0.000000e+00 : f32
    %31 = vector.broadcast %cst_30 : f32 to vector<16x20xf32>
    %32 = arith.maximumf %30, %31 : vector<16x20xf32>
    %c0_31 = arith.constant 0 : index
    %c0_32 = arith.constant 0 : index
    %33 = vector.load %arg6[%c0_31, %c0_32] : memref<20x8xf32, #tpu.memory_space<vmem>>, vector<20x8xf32>
    %cst_33 = arith.constant dense<0.000000e+00> : vector<16x8xf32>
    %34 = tpu.matmul %32, %33, %cst_33 {dimension_numbers = #tpu.dot_dimension_numbers<[1], [0], [0], [1], [0, 0, 1, 1], [], []>} : vector<16x20xf32>, vector<20x8xf32>, vector<16x8xf32> -> vector<16x8xf32>
    %c0_34 = arith.constant 0 : index
    %c0_35 = arith.constant 0 : index
    %c0_36 = arith.constant 0 : index
    %35 = vector.load %arg7[%c0_34, %c0_35, %c0_36] : memref<4x128x16xf32, #tpu.memory_space<vmem>>, vector<1x128x16xf32>
    %36 = vector.shape_cast %35 : vector<1x128x16xf32> to vector<128x16xf32>
    %37 = vector.extract_strided_slice %34 {offsets = [0, 0], sizes = [16, 2], strides = [1, 1]} : vector<16x8xf32> to vector<16x2xf32>
    %cst_37 = arith.constant dense<0.000000e+00> : vector<128x2xf32>
    %38 = tpu.matmul %36, %37, %cst_37 {dimension_numbers = #tpu.dot_dimension_numbers<[1], [0], [0], [1], [0, 0, 1, 1], [], []>} : vector<128x16xf32>, vector<16x2xf32>, vector<128x2xf32> -> vector<128x2xf32>
    %c1_38 = arith.constant 1 : index
    %c0_39 = arith.constant 0 : index
    %c0_40 = arith.constant 0 : index
    %39 = vector.load %arg7[%c1_38, %c0_39, %c0_40] : memref<4x128x16xf32, #tpu.memory_space<vmem>>, vector<1x128x16xf32>
    %40 = vector.shape_cast %39 : vector<1x128x16xf32> to vector<128x16xf32>
    %41 = vector.extract_strided_slice %34 {offsets = [0, 2], sizes = [16, 2], strides = [1, 1]} : vector<16x8xf32> to vector<16x2xf32>
    %cst_41 = arith.constant dense<0.000000e+00> : vector<128x2xf32>
    %42 = tpu.matmul %40, %41, %cst_41 {dimension_numbers = #tpu.dot_dimension_numbers<[1], [0], [0], [1], [0, 0, 1, 1], [], []>} : vector<128x16xf32>, vector<16x2xf32>, vector<128x2xf32> -> vector<128x2xf32>
    %43 = arith.addf %38, %42 : vector<128x2xf32>
    %c2_42 = arith.constant 2 : index
    %c0_43 = arith.constant 0 : index
    %c0_44 = arith.constant 0 : index
    %44 = vector.load %arg7[%c2_42, %c0_43, %c0_44] : memref<4x128x16xf32, #tpu.memory_space<vmem>>, vector<1x128x16xf32>
    %45 = vector.shape_cast %44 : vector<1x128x16xf32> to vector<128x16xf32>
    %46 = vector.extract_strided_slice %34 {offsets = [0, 4], sizes = [16, 2], strides = [1, 1]} : vector<16x8xf32> to vector<16x2xf32>
    %cst_45 = arith.constant dense<0.000000e+00> : vector<128x2xf32>
    %47 = tpu.matmul %45, %46, %cst_45 {dimension_numbers = #tpu.dot_dimension_numbers<[1], [0], [0], [1], [0, 0, 1, 1], [], []>} : vector<128x16xf32>, vector<16x2xf32>, vector<128x2xf32> -> vector<128x2xf32>
    %48 = arith.addf %43, %47 : vector<128x2xf32>
    %c3 = arith.constant 3 : index
    %c0_46 = arith.constant 0 : index
    %c0_47 = arith.constant 0 : index
    %49 = vector.load %arg7[%c3, %c0_46, %c0_47] : memref<4x128x16xf32, #tpu.memory_space<vmem>>, vector<1x128x16xf32>
    %50 = vector.shape_cast %49 : vector<1x128x16xf32> to vector<128x16xf32>
    %51 = vector.extract_strided_slice %34 {offsets = [0, 6], sizes = [16, 2], strides = [1, 1]} : vector<16x8xf32> to vector<16x2xf32>
    %cst_48 = arith.constant dense<0.000000e+00> : vector<128x2xf32>
    %52 = tpu.matmul %50, %51, %cst_48 {dimension_numbers = #tpu.dot_dimension_numbers<[1], [0], [0], [1], [0, 0, 1, 1], [], []>} : vector<128x16xf32>, vector<16x2xf32>, vector<128x2xf32> -> vector<128x2xf32>
    %53 = arith.addf %48, %52 : vector<128x2xf32>
    %c0_49 = arith.constant 0 : index
    %c0_50 = arith.constant 0 : index
    %54 = vector.load %arg8[%c0_49, %c0_50] : memref<128x1xf32, #tpu.memory_space<vmem>>, vector<128x1xf32>
    %55 = vector.broadcast %54 : vector<128x1xf32> to vector<128x2xf32>
    %56 = arith.addf %53, %55 : vector<128x2xf32>
    %cst_51 = arith.constant 0.000000e+00 : f32
    %57 = vector.broadcast %cst_51 : f32 to vector<128x2xf32>
    %58 = arith.maximumf %56, %57 : vector<128x2xf32>
    %c0_52 = arith.constant 0 : index
    %c0_53 = arith.constant 0 : index
    %59 = vector.load %arg9[%c0_52, %c0_53] : memref<8x128xf32, #tpu.memory_space<vmem>>, vector<8x128xf32>
    %cst_54 = arith.constant dense<0.000000e+00> : vector<8x2xf32>
    %60 = tpu.matmul %59, %58, %cst_54 {dimension_numbers = #tpu.dot_dimension_numbers<[1], [0], [0], [1], [0, 0, 1, 1], [], []>} : vector<8x128xf32>, vector<128x2xf32>, vector<8x2xf32> -> vector<8x2xf32>
    %c0_55 = arith.constant 0 : index
    %c0_56 = arith.constant 0 : index
    %61 = vector.load %arg10[%c0_55, %c0_56] : memref<8x1xf32, #tpu.memory_space<vmem>>, vector<8x1xf32>
    %62 = vector.broadcast %61 : vector<8x1xf32> to vector<8x2xf32>
    %63 = arith.addf %60, %62 : vector<8x2xf32>
    %c0_57 = arith.constant 0 : index
    %c0_58 = arith.constant 0 : index
    %64 = vector.load %arg11[%c0_57, %c0_58] : memref<8x2xf32, #tpu.memory_space<vmem>>, vector<8x2xf32>
    tpu.vector_store %arg11[%c0_57, %c0_58], %63 {strides = array<i32>} : memref<8x2xf32, #tpu.memory_space<vmem>>, vector<8x2xf32>,
    return
  }
}

</mosaic_0001>

<bundles_post_ra>
// kernel: wiki_eve_forward.1
= control target key start
LH: loop header
LB: loop body
LE: loop exit
PB: predicated region body
PF: predicated region fallthrough
CT: control target
= control target key end

     0   :  { %vm51_vm0 = vcmask 1043456   ;;  %v3223_v0 = vmov 0.0   ;;  %vm2455_vm1 = vmmov 0   ;;  %vm47_vm2 = vcmask 97280   ;;  %s2457_s30 = smov 126   ;;  %s2458_s16 = smov 124   ;;  %s3211_s0 = inlined_call_operand.vmem [shape: f32[12,128], index: 0, kind: input, shape index: {}]   ;;  %s3212_s1 = inlined_call_operand.vmem [shape: f32[8,12], index: 1, kind: input, shape index: {}]   ;;  %s3213_s2 = inlined_call_operand.vmem [shape: f32[8,1], index: 2, kind: input, shape index: {}]   ;;  %s3214_s3 = inlined_call_operand.vmem [shape: f32[3,128,20], index: 3, kind: input, shape index: {}]   ;;  %s3215_s5 = inlined_call_operand.vmem [shape: f32[16,1], index: 5, kind: input, shape index: {}]   ;;  %s3216_s4 = inlined_call_operand.vmem [shape: f32[3,16,8], index: 4, kind: input, shape index: {}]   ;;  %s3217_s6 = inlined_call_operand.vmem [shape: f32[20,8], index: 6, kind: input, shape index: {}]   ;;  %s3218_s7 = inlined_call_operand.vmem [shape: f32[4,128,16], index: 7, kind: input, shape index: {}]   ;;  %s3219_s8 = inlined_call_operand.vmem [shape: f32[128,1], index: 8, kind: input, shape index: {}]   ;;  %s3220_s10 = inlined_call_operand.vmem [shape: f32[8,1], index: 10, kind: input, shape index: {}]   ;;  %s3221_s9 = inlined_call_operand.vmem [shape: f32[8,128], index: 9, kind: input, shape index: {}]   ;;  %s3222_s11 = inlined_call_operand.vmem [shape: f32[8,2], index: 11, kind: output, shape index: {}]  }
   0x1   :  { %2163 = vmatprep.subr.mxu0 %v3223_v0  ;;  %v40_v1 = vld [vmem:[%s3211_s0 + $0x8] sm:$0xf]  ;;  %v39_v2 = vld [vmem:[%s3211_s0] sm:$0xff]  ;;  %2167 = vmatprep.mubr.msk.f32.mxu0 %vm2455_vm1, %v3223_v0  ;;  %v2456_v4 = vmov 0   ;;  %v143_v6 = vld [vmem:[%s3214_s3 + $0x78] sm:$0xff]  ;;  %vm304_vm3 = vcmask 64512  }
   0x2   :  { %2164 = vmatpush3.msk.msra.mxu0 %vm51_vm0, %v40_v1  ;;  %v38_v3 = vld [vmem:[%s3212_s1] sm:$0xff]  ;;  %2452 = vset.pattern.permute.xlu0 %v2456_v4  ;;  %v1866_v8 = vld [vmem:[%s3214_s3 + $0xf8] sm:$0xff]  ;;  %v142_v9 = vld [vmem:[%s3214_s3 + $0x70] sm:$0xff]  ;;  %vm659_vm4 = vcmask 162816   ;;  %vm785_vm5 = vcmask 130048   ;;  %vm1841_vm6 = vcmask 15360  }
   0x3   :  { %v41_v5 = vld [vmem:[%s3213_s2] sm:$0xff]  ;;  %2165 = vmatprep.subr.mxu0 %v3223_v0  ;;  %2170 = vmatprep.subr.mxu1 %v3223_v0  ;;  %v1865_v10 = vld [vmem:[%s3214_s3 + $0xf0] sm:$0xff]  ;;  %v141_v11 = vld [vmem:[%s3214_s3 + $0x68] sm:$0xff] }
   0x4   :  { %44 = vperm.xlu0 %2452, %v41_v5   ;;  %2166 = vmatpush3.msra.mxu0 %v39_v2  ;;  %v640_v7 = vld [vmem:[%s3215_s5] sm:$0xff]  ;;  %v1864_v12 = vld [vmem:[%s3214_s3 + $0xe8] sm:$0xff]  ;;  %v139_v15 = vld [vmem:[%s3214_s3 + $0x58] sm:$0xff] }
   0x5   :  { %2168 = vmatmul.mubr.msk.f32.vlgmr.msra.gmra.mxu0 %vm47_vm2, %v38_v3  ;;  %2171 = vmatpush3.msra.mxu1 %v143_v6  ;;  %v140_v13 = vld [vmem:[%s3214_s3 + $0x60] sm:$0xff]  ;;  %v1862_v16 = vld [vmem:[%s3214_s3 + $0xd8] sm:$0xff]  ;;  %v138_v17 = vld [vmem:[%s3214_s3 + $0x50] sm:$0xff] }
   0x6   :  { %2205 = vmatprep.subr.mxu0 %v3223_v0  ;;  %2172 = vmatprep.subr.mxu1 %v3223_v0  ;;  %v1863_v14 = vld [vmem:[%s3214_s3 + $0xe0] sm:$0xff]  ;;  %v1861_v18 = vld [vmem:[%s3214_s3 + $0xd0] sm:$0xff]  ;;  %v137_v19 = vld [vmem:[%s3214_s3 + $0x48] sm:$0xff] }
   0x7   :  { %2206 = vmatpush3.msra.mxu0 %v1866_v8  ;;  %2173 = vmatpush3.msra.mxu1 %v142_v9  ;;  %v1860_v20 = vld [vmem:[%s3214_s3 + $0xc8] sm:$0xff]  ;;  %v136_v21 = vld [vmem:[%s3214_s3 + $0x40] sm:$0xff]  ;;  %v135_v23 = vld [vmem:[%s3214_s3 + $0x38] sm:$0xff] }
   0x8   :  { %644 = vperm.xlu0 %2452, %v640_v7   ;;  %2207 = vmatprep.subr.mxu0 %v3223_v0  ;;  %v1859_v22 = vld [vmem:[%s3214_s3 + $0xc0] sm:$0xff]  ;;  %v1858_v24 = vld [vmem:[%s3214_s3 + $0xb8] sm:$0xff]  ;;  %v134_v25 = vld [vmem:[%s3214_s3 + $0x30] sm:$0xff] }
   0x9   :  { %2174 = vmatprep.subr.mxu1 %v3223_v0  ;;  %2208 = vmatpush3.msra.mxu0 %v1865_v10  ;;  %v1857_v26 = vld [vmem:[%s3214_s3 + $0xb0] sm:$0xff]  ;;  %v133_v27 = vld [vmem:[%s3214_s3 + $0x28] sm:$0xff]  ;;  %v132_v29 = vld [vmem:[%s3214_s3 + $0x20] sm:$0xff] }
   0xa   :  { %2175 = vmatpush3.msra.mxu1 %v141_v11  ;;  %2209 = vmatprep.subr.mxu0 %v3223_v0  ;;  %v1856_v28 = vld [vmem:[%s3214_s3 + $0xa8] sm:$0xff]  ;;  %v1855_v30 = vld [vmem:[%s3214_s3 + $0xa0] sm:$0xff]  ;;  %v131_v31 = vld [vmem:[%s3214_s3 + $0x18] sm:$0xff] }
   0xb   :  { %2176 = vmatprep.subr.mxu1 %v3223_v0  ;;  %2210 = vmatpush3.msra.mxu0 %v1864_v12  ;;  %v1854_v32 = vld [vmem:[%s3214_s3 + $0x98] sm:$0xff]  ;;  %v130_v33 = vld [vmem:[%s3214_s3 + $0x10] sm:$0xff]  ;;  %v129_v35 = vld [vmem:[%s3214_s3 + $0x8] sm:$0xff] }
   0xc   :  { %2177 = vmatpush3.msra.mxu1 %v140_v13  ;;  %2211 = vmatprep.subr.mxu0 %v3223_v0  ;;  %v1853_v34 = vld [vmem:[%s3214_s3 + $0x90] sm:$0xff]  ;;  %v1852_v36 = vld [vmem:[%s3214_s3 + $0x88] sm:$0xff]  ;;  %v128_v37 = vld [vmem:[%s3214_s3] sm:$0xff] }
   0xd   :  { %2178 = vmatprep.subr.mxu1 %v3223_v0  ;;  %2212 = vmatpush3.msra.mxu0 %v1863_v14  ;;  %v1851_v38 = vld [vmem:[%s3214_s3 + $0x80] sm:$0xff]  ;;  %v1888_v44 = vld [vmem:[%s3214_s3 + $0x178] sm:$0xff]  ;;  %v1887_v45 = vld [vmem:[%s3214_s3 + $0x170] sm:$0xff] }
   0xe   :  { %2179 = vmatpush3.msra.mxu1 %v139_v15  ;;  %2213 = vmatprep.subr.mxu0 %v3223_v0  ;;  %v1886_v46 = vld [vmem:[%s3214_s3 + $0x168] sm:$0xff]  ;;  %v1885_v47 = vld [vmem:[%s3214_s3 + $0x160] sm:$0xff]  ;;  %v1884_v48 = vld [vmem:[%s3214_s3 + $0x158] sm:$0xff] }
   0xf   :  { %2180 = vmatprep.subr.mxu1 %v3223_v0  ;;  %2214 = vmatpush3.msra.mxu0 %v1862_v16  ;;  %v1883_v49 = vld [vmem:[%s3214_s3 + $0x150] sm:$0xff]  ;;  %v1882_v50 = vld [vmem:[%s3214_s3 + $0x148] sm:$0xff]  ;;  %v1881_v51 = vld [vmem:[%s3214_s3 + $0x140] sm:$0xff] }
  0x10   :  { %2181 = vmatpush3.msra.mxu1 %v138_v17  ;;  %2215 = vmatprep.subr.mxu0 %v3223_v0  ;;  %v1880_v52 = vld [vmem:[%s3214_s3 + $0x138] sm:$0xff]  ;;  %v1879_v53 = vld [vmem:[%s3214_s3 + $0x130] sm:$0xff]  ;;  %v1878_v54 = vld [vmem:[%s3214_s3 + $0x128] sm:$0xff] }
  0x11   :  { %2182 = vmatprep.subr.mxu1 %v3223_v0  ;;  %2216 = vmatpush3.msra.mxu0 %v1861_v18  ;;  %v1877_v55 = vld [vmem:[%s3214_s3 + $0x120] sm:$0xff]  ;;  %v1876_v56 = vld [vmem:[%s3214_s3 + $0x118] sm:$0xff]  ;;  %v1875_v57 = vld [vmem:[%s3214_s3 + $0x110] sm:$0xff] }
  0x12   :  { %2183 = vmatpush3.msra.mxu1 %v137_v19  ;;  %2217 = vmatprep.subr.mxu0 %v3223_v0  ;;  %v1874_v58 = vld [vmem:[%s3214_s3 + $0x108] sm:$0xff]  ;;  %v1873_v59 = vld [vmem:[%s3214_s3 + $0x100] sm:$0xff]  ;;  %v1849_v60 = vld [vmem:[%s3216_s4 + $0x10] sm:$0xff] }
  0x13   :  { %2184 = vmatprep.subr.mxu1 %v3223_v0  ;;  %2218 = vmatpush3.msra.mxu0 %v1860_v20  ;;  %v641_v61 = vld [vmem:[%s3215_s5 + $0x8] sm:$0xff]  ;;  %v1850_v1 = vld [vmem:[%s3216_s4 + $0x18] sm:$0xff]  ;;  %v126_v2 = vld [vmem:[%s3216_s4] sm:$0xff]  ;;  %s2459_s5 = smov 122  }
  0x14   :  { %2185 = vmatpush3.msra.mxu1 %v136_v21  ;;  %2219 = vmatprep.subr.mxu0 %v3223_v0  ;;  %v127_v5 = vld [vmem:[%s3216_s4 + $0x8] sm:$0xff]  ;;  %v1871_v6 = vld [vmem:[%s3216_s4 + $0x20] sm:$0xff]  ;;  %v658_v10 = vld [vmem:[%s3217_s6 + $0x10] sm:$0xf] }
  0x15   :  { %2186 = vmatprep.subr.mxu1 %v3223_v0  ;;  %2220 = vmatpush3.msra.mxu0 %v1859_v22  ;;  %v1872_v8 = vld [vmem:[%s3216_s4 + $0x28] sm:$0xff]  ;;  %v656_v12 = vld [vmem:[%s3217_s6] sm:$0xff] }
  0x16   :  { %2187 = vmatpush3.msra.mxu1 %v135_v23  ;;  %2221 = vmatprep.subr.mxu0 %v3223_v0  ;;  %v657_v11 = vld [vmem:[%s3217_s6 + $0x8] sm:$0xff] }
  0x17   :  { %2188 = vmatprep.subr.mxu1 %v3223_v0  ;;  %2222 = vmatpush3.msra.mxu0 %v1858_v24 }
  0x18   :  { %2189 = vmatpush3.msra.mxu1 %v134_v25  ;;  %2223 = vmatprep.subr.mxu0 %v3223_v0 }
  0x19   :  { %2190 = vmatprep.subr.mxu1 %v3223_v0  ;;  %2224 = vmatpush3.msra.mxu0 %v1857_v26 }
  0x1a   :  { %2191 = vmatpush3.msra.mxu1 %v133_v27  ;;  %2225 = vmatprep.subr.mxu0 %v3223_v0 }
  0x1b   :  { %2192 = vmatprep.subr.mxu1 %v3223_v0  ;;  %2226 = vmatpush3.msra.mxu0 %v1856_v28 }
  0x1c   :  { %2193 = vmatpush3.msra.mxu1 %v132_v29  ;;  %2227 = vmatprep.subr.mxu0 %v3223_v0  ;;  %v1894_v29 = vld [vmem:[%s3218_s7 + $0x80] sm:$0xff] }
  0x1d   :  { %2194 = vmatprep.subr.mxu1 %v3223_v0  ;;  %2228 = vmatpush3.msra.mxu0 %v1855_v30  ;;  %v744_v30 = vld [vmem:[%s3218_s7] sm:$0xff] }
  0x1e   :  { %2195 = vmatpush3.msra.mxu1 %v131_v31  ;;  %2229 = vmatprep.subr.mxu0 %v3223_v0 }
  0x1f   :  { %2196 = vmatprep.subr.mxu1 %v3223_v0  ;;  %2230 = vmatpush3.msra.mxu0 %v1854_v32 }
  0x20   :  { %2197 = vmatpush3.msra.mxu1 %v130_v33  ;;  %2231 = vmatprep.subr.mxu0 %v3223_v0  ;;  %v745_v33 = vld [vmem:[%s3218_s7 + $0x8] sm:$0xff] }
  0x21   :  { %2198 = vmatprep.subr.mxu1 %v3223_v0  ;;  %2202 = vmatprep.mubr.msk.f32.mxu1 %vm2455_vm1, %v3223_v0 }
  0x22   :  { %2237 = vmatprep.mubr.msk.f32.mxu0 %vm2455_vm1, %v3223_v0  ;;  %2453 = vset.pattern.permute.xlu1 %v2456_v4 }
  0x23   :  { %2232 = vmatpush3.msra.mxu0 %v1853_v34  ;;  %2199 = vmatpush3.msra.mxu1 %v129_v35  ;;  %v746_v34 = vld [vmem:[%s3218_s7 + $0x10] sm:$0xff]  ;;  %v747_v35 = vld [vmem:[%s3218_s7 + $0x18] sm:$0xff] }
  0x24   :  { %2233 = vmatprep.subr.mxu0 %v3223_v0  ;;  %2200 = vmatprep.subr.mxu1 %v3223_v0 }
  0x25   :  { %2234 = vmatpush3.msra.mxu0 %v1852_v36  ;;  %2201 = vmatpush3.msra.mxu1 %v128_v37  ;;  %v748_v36 = vld [vmem:[%s3218_s7 + $0x20] sm:$0xff]  ;;  %v1651_v37 = vld [vmem:[%s3219_s8 + $0x78] sm:$0xff] }
  0x26   :  { %2235 = vmatprep.subr.mxu0 %v3223_v0  ;;  %2250 = vmatprep.subr.mxu1 %v3223_v0 }
  0x27   :  { %2236 = vmatpush3.msra.mxu0 %v1851_v38  ;;  %649 = vperm.xlu1 %2453, %v641_v61   ;;  %v749_v38 = vld [vmem:[%s3218_s7 + $0x28] sm:$0xff]  ;;  %v1639_v61 = vld [vmem:[%s3219_s8 + $0x18] sm:$0xff] }
  0x7f   :  { %v45_v39 = vpop.permute.xlu0 %44 }
  0x83   :  { %v645_v24 = vpop.permute.xlu0 %644 }
  0xa2   :  { %v650_v21 = vpop.permute.xlu1 %649 }
  0xc5   :  { %v121_v40 = vpop.f32.mrf.mxu0 }
  0xc6   :  { %v122_v41 = vadd.f32 %v121_v40, %v45_v39  ;;  %v750_v39 = vld [vmem:[%s3218_s7 + $0x30] sm:$0xff] }
  0xc7   :  { %v2169_v42 = vpop.f32.mrf.mxu0  ;;  %v1650_v40 = vld [vmem:[%s3219_s8 + $0x70] sm:$0xff] }
  0xc8   :  { %v125_v43 = vmax.f32 %v122_v41, 0.0  ;;  %v1649_v41 = vld [vmem:[%s3219_s8 + $0x68] sm:$0xff]  ;;  %v751_v42 = vld [vmem:[%s3218_s7 + $0x38] sm:$0xff] }
  0xca   :  { %2203 = vmatmul.mubr.f32.vlgmr.msra.gmra.mxu1 %v125_v43  ;;  %2238 = vmatmul.mubr.f32.vlgmr.msra.gmra.mxu0 %v125_v43 }
  0xcb   :  { %2251 = vmatpush3.msra.mxu1 %v1888_v44  ;;  %2282 = vmatprep.mubr.msk.f32.mxu1 %vm2455_vm1, %v3223_v0  ;;  %v1648_v44 = vld [vmem:[%s3219_s8 + $0x60] sm:$0xff] }
  0xcc   :  { %2252 = vmatprep.subr.mxu1 %v3223_v0  ;;  %2242 = vmatprep.mubr.msk.f32.mxu0 %vm304_vm3, %v1849_v60  ;;  %v1640_v60 = vld [vmem:[%s3219_s8 + $0x20] sm:$0xff] }
  0xcd   :  { %2253 = vmatpush3.msra.mxu1 %v1887_v45  ;;  %v1647_v45 = vld [vmem:[%s3219_s8 + $0x58] sm:$0xff] }
  0xce   :  { %2254 = vmatprep.subr.mxu1 %v3223_v0 }
  0xcf   :  { %2255 = vmatpush3.msra.mxu1 %v1886_v46  ;;  %v753_v46 = vld [vmem:[%s3218_s7 + $0x48] sm:$0xff] }
  0xd0   :  { %2256 = vmatprep.subr.mxu1 %v3223_v0 }
  0xd1   :  { %2257 = vmatpush3.msra.mxu1 %v1885_v47  ;;  %v754_v47 = vld [vmem:[%s3218_s7 + $0x50] sm:$0xff] }
  0xd2   :  { %2258 = vmatprep.subr.mxu1 %v3223_v0 }
  0xd3   :  { %2259 = vmatpush3.msra.mxu1 %v1884_v48  ;;  %v1646_v48 = vld [vmem:[%s3219_s8 + $0x50] sm:$0xff] }
  0xd4   :  { %2260 = vmatprep.subr.mxu1 %v3223_v0 }
  0xd5   :  { %2261 = vmatpush3.msra.mxu1 %v1883_v49  ;;  %v1645_v49 = vld [vmem:[%s3219_s8 + $0x48] sm:$0xff] }
  0xd6   :  { %2262 = vmatprep.subr.mxu1 %v3223_v0 }
  0xd7   :  { %2263 = vmatpush3.msra.mxu1 %v1882_v50  ;;  %v755_v50 = vld [vmem:[%s3218_s7 + $0x58] sm:$0xff] }
  0xd8   :  { %2264 = vmatprep.subr.mxu1 %v3223_v0 }
  0xd9   :  { %2265 = vmatpush3.msra.mxu1 %v1881_v51  ;;  %v756_v51 = vld [vmem:[%s3218_s7 + $0x60] sm:$0xff] }
  0xda   :  { %2266 = vmatprep.subr.mxu1 %v3223_v0 }
  0xdb   :  { %2267 = vmatpush3.msra.mxu1 %v1880_v52  ;;  %v1644_v52 = vld [vmem:[%s3219_s8 + $0x40] sm:$0xff] }
  0xdc   :  { %2268 = vmatprep.subr.mxu1 %v3223_v0 }
  0xdd   :  { %2269 = vmatpush3.msra.mxu1 %v1879_v53  ;;  %v1643_v53 = vld [vmem:[%s3219_s8 + $0x38] sm:$0xff] }
  0xde   :  { %2270 = vmatprep.subr.mxu1 %v3223_v0 }
  0xdf   :  { %2271 = vmatpush3.msra.mxu1 %v1878_v54  ;;  %v757_v54 = vld [vmem:[%s3218_s7 + $0x68] sm:$0xff] }
  0xe0   :  { %2272 = vmatprep.subr.mxu1 %v3223_v0 }
  0xe1   :  { %2273 = vmatpush3.msra.mxu1 %v1877_v55  ;;  %v758_v55 = vld [vmem:[%s3218_s7 + $0x70] sm:$0xff] }
  0xe2   :  { %2274 = vmatprep.subr.mxu1 %v3223_v0 }
  0xe3   :  { %2275 = vmatpush3.msra.mxu1 %v1876_v56  ;;  %v1642_v56 = vld [vmem:[%s3219_s8 + $0x30] sm:$0xff] }
  0xe4   :  { %2276 = vmatprep.subr.mxu1 %v3223_v0 }
  0xe5   :  { %2277 = vmatpush3.msra.mxu1 %v1875_v57  ;;  %v1641_v57 = vld [vmem:[%s3219_s8 + $0x28] sm:$0xff] }
  0xe6   :  { %2278 = vmatprep.subr.mxu1 %v3223_v0 }
  0xe7   :  { %2279 = vmatpush3.msra.mxu1 %v1874_v58  ;;  %v759_v58 = vld [vmem:[%s3218_s7 + $0x78] sm:$0xff] }
  0xe8   :  { %2280 = vmatprep.subr.mxu1 %v3223_v0 }
  0xe9   :  { %2281 = vmatpush3.msra.mxu1 %v1873_v59  ;;  %v1974_v59 = vld [vmem:[%s3218_s7 + $0x180] sm:$0xff] }
  0xea   :  { %2283 = vmatmul.mubr.f32.vlgmr.msra.gmra.mxu1 %v125_v43  ;;  %v752_v43 = vld [vmem:[%s3218_s7 + $0x40] sm:$0xff] }
  0xeb   :  { %2331 = vmatprep.mubr.msk.f32.mxu1 %vm785_vm5, %v744_v30  ;;  %v1983_v30 = vld [vmem:[%s3218_s7 + $0x1c8] sm:$0xff] }
 0x18a   :  { %v210_v62 = vpop.f32.mrf.mxu1  ;;  %v300_v63 = vpop.f32.mrf.mxu0 }
 0x18b   :  { %2240 = vmatprep.subr.mxu0 %v300_v63 }
 0x18c   :  { %v2204_v3 = vpop.f32.mrf.mxu1  ;;  %v2239_v4 = vpop.f32.mrf.mxu0  ;;  %2241 = vmatpush3.msra.mxu0 %v300_v63  ;;  %v1637_v63 = vld [vmem:[%s3219_s8 + $0x8] sm:$0xff] }
 0x18d   :  { %2245 = vmatprep.subr.mxu0 %v210_v62  ;;  %2243 = vmatmul.mubr.msk.f32.vlgmr.msra.gmra.mxu0 %vm304_vm3, %v1850_v1  ;;  %v1636_v1 = vld [vmem:[%s3219_s8] sm:$0xff] }
 0x18e   :  { %2246 = vmatpush3.msra.mxu0 %v210_v62  ;;  %2247 = vmatprep.mubr.msk.f32.mxu0 %vm304_vm3, %v126_v2  ;;  %v1638_v62 = vld [vmem:[%s3219_s8 + $0x10] sm:$0xff]  ;;  %v1765_v2 = vld [vmem:[%s3220_s10] sm:$0xff] }
 0x191   :  { %2248 = vmatmul.mubr.msk.f32.vlgmr.msra.gmra.mxu0 %vm304_vm3, %v127_v5  ;;  %v1895_v5 = vld [vmem:[%s3218_s7 + $0x88] sm:$0xff] }
 0x192   :  { %2287 = vmatprep.mubr.msk.f32.mxu0 %vm304_vm3, %v1871_v6  ;;  %v1896_v6 = vld [vmem:[%s3218_s7 + $0x90] sm:$0xff] }
 0x1aa   :  { %v553_v7 = vpop.f32.mrf.mxu1 }
 0x1ab   :  { %2285 = vmatprep.subr.mxu0 %v553_v7 }
 0x1ac   :  { %v2284_v9 = vpop.f32.mrf.mxu1  ;;  %2286 = vmatpush3.msra.mxu0 %v553_v7 }
 0x1ad   :  { %2288 = vmatmul.mubr.msk.f32.vlgmr.msra.gmra.mxu0 %vm304_vm3, %v1872_v8  ;;  %2290 = vmatprep.subr.msk.mxu0 %vm51_vm0, %v658_v10  ;;  %v1897_v9 = vld [vmem:[%s3218_s7 + $0x98] sm:$0xff] }
 0x1ae   :  { %2291 = vmatpush3.msk.msra.mxu0 %vm51_vm0, %v658_v10  ;;  %v1898_v10 = vld [vmem:[%s3218_s7 + $0xa0] sm:$0xff] }
 0x1af   :  { %2292 = vmatprep.subr.mxu0 %v657_v11 }
 0x1b0   :  { %2293 = vmatpush3.msra.mxu0 %v657_v11 }
 0x1b1   :  { %2294 = vmatprep.subr.mxu0 %v656_v12 }
 0x1b2   :  { %2295 = vmatpush3.msra.mxu0 %v656_v12 }
 0x24d   :  { %v2244_v13 = vpop.f32.mrf.mxu0 }
 0x24f   :  { %v377_v14 = vpop.f32.mrf.mxu0 }
 0x251   :  { %v2249_v15 = vpop.f32.mrf.mxu0 }
 0x252   :  { %v464_v17 = vadd.f32 %v2249_v15, %v2244_v13  ;;  %v1899_v13 = vld [vmem:[%s3218_s7 + $0xa8] sm:$0xff]  ;;  %v1900_v15 = vld [vmem:[%s3218_s7 + $0xb0] sm:$0xff] }
 0x253   :  { %v458_v16 = vpop.f32.mrf.mxu0 }
 0x254   :  { %v459_v19 = vadd.f32 %v458_v16, %v377_v14  ;;  %v1975_v14 = vld [vmem:[%s3218_s7 + $0x188] sm:$0xff]  ;;  %v1976_v16 = vld [vmem:[%s3218_s7 + $0x190] sm:$0xff] }
 0x26d   :  { %v2289_v18 = vpop.f32.mrf.mxu0 }
 0x26e   :  { %v639_v20 = vadd.f32 %v2289_v18, %v464_v17  ;;  %v1901_v17 = vld [vmem:[%s3218_s7 + $0xb8] sm:$0xff] }
 0x26f   :  { %v629_v22 = vpop.f32.mrf.mxu0  ;;  %v1977_v18 = vld [vmem:[%s3218_s7 + $0x198] sm:$0xff] }
 0x270   :  { %v638_v23 = vadd.f32 %v629_v22, %v459_v19  ;;  %v653_v25 = vadd.f32 %v650_v21, %v639_v20  ;;  %v1902_v19 = vld [vmem:[%s3218_s7 + $0xc0] sm:$0xff]  ;;  %v1903_v21 = vld [vmem:[%s3218_s7 + $0xc8] sm:$0xff] }
 0x271   :  { %v1978_v20 = vld [vmem:[%s3218_s7 + $0x1a0] sm:$0xff]  ;;  %v1979_v22 = vld [vmem:[%s3218_s7 + $0x1a8] sm:$0xff] }
 0x272   :  { %v652_v26 = vadd.f32 %v645_v24, %v638_v23  ;;  %v655_v28 = vmax.f32 %v653_v25, 0.0  ;;  %v1904_v23 = vld [vmem:[%s3218_s7 + $0xd0] sm:$0xff]  ;;  %v1905_v25 = vld [vmem:[%s3218_s7 + $0xd8] sm:$0xff] }
 0x273   :  { %v1980_v24 = vld [vmem:[%s3218_s7 + $0x1b0] sm:$0xff] }
 0x274   :  { %v654_v27 = vmax.f32 %v652_v26, 0.0  ;;  %v1981_v26 = vld [vmem:[%s3218_s7 + $0x1b8] sm:$0xff] }
 0x276   :  { %2296 = vmatprep.mubr.msk.f32.mxu0 %vm659_vm4, %v654_v27  ;;  %v1906_v27 = vld [vmem:[%s3218_s7 + $0xe0] sm:$0xff] }
 0x277   :  { %2297 = vmatmul.mubr.msk.f32.vlgmr.msra.gmra.mxu0 %vm659_vm4, %v655_v28  ;;  %v1982_v28 = vld [vmem:[%s3218_s7 + $0x1c0] sm:$0xff] }
 0x278   :  { %2303 = vmatprep.mubr.msk.f32.mxu0 %vm785_vm5, %v1894_v29  ;;  %v1907_v29 = vld [vmem:[%s3218_s7 + $0xe8] sm:$0xff] }
 0x337   :  { %v2298_v31 = vpop.f32.mrf.mxu0 }
 0x338   :  { %781 = vrot.lane.b32.xlu1 %v2298_v31, %s2457_s30  ;;  %2327 = vmatprep.subr.mxu1 %v2298_v31 }
 0x339   :  { %v735_v32 = vpop.f32.mrf.mxu0  ;;  %2328 = vmatpush3.msra.mxu1 %v2298_v31 }
 0x33a   :  { %779 = vrot.lane.b32.xlu0 %v735_v32, %s2457_s30  ;;  %2329 = vmatprep.subr.mxu1 %v735_v32 }
 0x33b   :  { %2330 = vmatpush3.msra.mxu1 %v735_v32 }
 0x33c   :  { %1191 = vrot.lane.b32.xlu1 %v2298_v31, %s2458_s16  ;;  %2332 = vmatmul.mubr.msk.f32.vlgmr.msra.gmra.mxu1 %vm785_vm5, %v745_v33  ;;  %v1909_v33 = vld [vmem:[%s3218_s7 + $0xf8] sm:$0xff] }
 0x33d   :  { %2334 = vmatprep.mubr.msk.f32.mxu1 %vm785_vm5, %v746_v34  ;;  %v1985_v34 = vld [vmem:[%s3218_s7 + $0x1d8] sm:$0xff] }
 0x33e   :  { %1189 = vrot.lane.b32.xlu0 %v735_v32, %s2458_s16 }
 0x340   :  { %1423 = vrot.lane.b32.xlu1 %v2298_v31, %s2459_s5  ;;  %2335 = vmatmul.mubr.msk.f32.gmra.mxu1 %vm785_vm5, %v747_v35  ;;  %v1908_v31 = vld [vmem:[%s3218_s7 + $0xf0] sm:$0xff]  ;;  %v1942_v35 = vld [vmem:[%s3218_s7 + $0x100] sm:$0xff] }
 0x341   :  { %2337 = vmatprep.mubr.msk.f32.mxu1 %vm785_vm5, %v748_v36  ;;  %v1986_v36 = vld [vmem:[%s3218_s7 + $0x1e0] sm:$0xff] }
 0x342   :  { %1421 = vrot.lane.b32.xlu0 %v735_v32, %s2459_s5  ;;  %v1984_v32 = vld [vmem:[%s3218_s7 + $0x1d0] sm:$0xff] }
 0x344   :  { %1729 = vperm.xlu1 %2453, %v1651_v37   ;;  %2338 = vmatmul.mubr.msk.f32.gmra.mxu1 %vm785_vm5, %v749_v38  ;;  %v1943_v37 = vld [vmem:[%s3218_s7 + $0x108] sm:$0xff] }
 0x345   :  { %2340 = vmatprep.mubr.msk.f32.mxu1 %vm785_vm5, %v750_v39  ;;  %v1987_v38 = vld [vmem:[%s3218_s7 + $0x1e8] sm:$0xff]  ;;  %v1944_v39 = vld [vmem:[%s3218_s7 + $0x110] sm:$0xff] }
 0x346   :  { %1724 = vperm.xlu0 %2452, %v1650_v40   ;;  %v1988_v40 = vld [vmem:[%s3218_s7 + $0x1f0] sm:$0xff] }
 0x348   :  { %1719 = vperm.xlu1 %2453, %v1649_v41   ;;  %2341 = vmatmul.mubr.msk.f32.gmra.mxu1 %vm785_vm5, %v751_v42  ;;  %v1945_v41 = vld [vmem:[%s3218_s7 + $0x118] sm:$0xff] }
 0x349   :  { %2343 = vmatprep.mubr.msk.f32.mxu1 %vm785_vm5, %v752_v43  ;;  %v1989_v42 = vld [vmem:[%s3218_s7 + $0x1f8] sm:$0xff]  ;;  %v1946_v43 = vld [vmem:[%s3218_s7 + $0x120] sm:$0xff] }
 0x34a   :  { %1714 = vperm.xlu0 %2452, %v1648_v44   ;;  %v1947_v44 = vld [vmem:[%s3218_s7 + $0x128] sm:$0xff] }
 0x34c   :  { %1709 = vperm.xlu1 %2453, %v1647_v45   ;;  %2344 = vmatmul.mubr.msk.f32.gmra.mxu1 %vm785_vm5, %v753_v46  ;;  %v1948_v45 = vld [vmem:[%s3218_s7 + $0x130] sm:$0xff]  ;;  %v1949_v46 = vld [vmem:[%s3218_s7 + $0x138] sm:$0xff] }
 0x34d   :  { %2346 = vmatprep.mubr.msk.f32.mxu1 %vm785_vm5, %v754_v47  ;;  %v1950_v47 = vld [vmem:[%s3218_s7 + $0x140] sm:$0xff] }
 0x34e   :  { %1704 = vperm.xlu0 %2452, %v1646_v48   ;;  %v1951_v48 = vld [vmem:[%s3218_s7 + $0x148] sm:$0xff] }
 0x350   :  { %1699 = vperm.xlu1 %2453, %v1645_v49   ;;  %2347 = vmatmul.mubr.msk.f32.gmra.mxu1 %vm785_vm5, %v755_v50  ;;  %v1952_v49 = vld [vmem:[%s3218_s7 + $0x150] sm:$0xff]  ;;  %v1953_v50 = vld [vmem:[%s3218_s7 + $0x158] sm:$0xff] }
 0x351   :  { %2349 = vmatprep.mubr.msk.f32.mxu1 %vm785_vm5, %v756_v51  ;;  %v1954_v51 = vld [vmem:[%s3218_s7 + $0x160] sm:$0xff] }
 0x352   :  { %1694 = vperm.xlu0 %2452, %v1644_v52   ;;  %v1955_v52 = vld [vmem:[%s3218_s7 + $0x168] sm:$0xff] }
 0x354   :  { %1689 = vperm.xlu1 %2453, %v1643_v53   ;;  %2350 = vmatmul.mubr.msk.f32.gmra.mxu1 %vm785_vm5, %v757_v54  ;;  %v1956_v53 = vld [vmem:[%s3218_s7 + $0x170] sm:$0xff]  ;;  %v1957_v54 = vld [vmem:[%s3218_s7 + $0x178] sm:$0xff] }
 0x355   :  { %2352 = vmatprep.mubr.msk.f32.mxu1 %vm785_vm5, %v758_v55 }
 0x356   :  { %1684 = vperm.xlu0 %2452, %v1642_v56  }
 0x358   :  { %1679 = vperm.xlu1 %2453, %v1641_v57   ;;  %2353 = vmatmul.mubr.msk.f32.gmra.mxu1 %vm785_vm5, %v759_v58 }
 0x359   :  { %2387 = vmatprep.mubr.msk.f32.mxu1 %vm785_vm5, %v1974_v59 }
 0x35a   :  { %1674 = vperm.xlu0 %2452, %v1640_v60  }
 0x35c   :  { %1669 = vperm.xlu1 %2453, %v1639_v61  }
 0x35e   :  { %1664 = vperm.xlu0 %2452, %v1638_v62  }
 0x360   :  { %1659 = vperm.xlu1 %2453, %v1637_v63  }
 0x362   :  { %1654 = vperm.xlu0 %2452, %v1636_v1  }
 0x364   :  { %1768 = vperm.xlu1 %2453, %v1765_v2  }
 0x3aa   :  { %v782_v3 = vpop.permute.xlu1 %781 }
 0x3ab   :  { %2299 = vmatprep.subr.mxu0 %v782_v3 }
 0x3ac   :  { %2300 = vmatpush3.msra.mxu0 %v782_v3  ;;  %v780_v4 = vpop.permute.xlu0 %779 }
 0x3ad   :  { %2301 = vmatprep.subr.mxu0 %v780_v4 }
 0x3ae   :  { %v1192_v7 = vpop.permute.xlu1 %1191  ;;  %2302 = vmatpush3.msra.mxu0 %v780_v4 }
 0x3af   :  { %2304 = vmatmul.mubr.msk.f32.vlgmr.msra.gmra.mxu0 %vm785_vm5, %v1895_v5  ;;  %2355 = vmatprep.subr.mxu0 %v1192_v7 }
 0x3b0   :  { %2356 = vmatpush3.msra.mxu0 %v1192_v7  ;;  %v1190_v8 = vpop.permute.xlu0 %1189  ;;  %2306 = vmatprep.mubr.msk.f32.mxu0 %vm785_vm5, %v1896_v6 }
 0x3b1   :  { %2357 = vmatprep.subr.mxu0 %v1190_v8 }
 0x3b2   :  { %v1424_v11 = vpop.permute.xlu1 %1423  ;;  %2358 = vmatpush3.msra.mxu0 %v1190_v8 }
 0x3b3   :  { %2307 = vmatmul.mubr.msk.f32.gmra.mxu0 %vm785_vm5, %v1897_v9  ;;  %2383 = vmatprep.subr.mxu1 %v1424_v11 }
 0x3b4   :  { %v1422_v12 = vpop.permute.xlu0 %1421  ;;  %2384 = vmatpush3.msra.mxu1 %v1424_v11  ;;  %2309 = vmatprep.mubr.msk.f32.mxu0 %vm785_vm5, %v1898_v10 }
 0x3b5   :  { %2385 = vmatprep.subr.mxu1 %v1422_v12  ;;  %2411 = vmatprep.subr.mxu0 %v3223_v0 }
 0x3b6   :  { %2386 = vmatpush3.msra.mxu1 %v1422_v12 }
 0x3b7   :  { %2310 = vmatmul.mubr.msk.f32.gmra.mxu0 %vm785_vm5, %v1899_v13  ;;  %2388 = vmatmul.mubr.msk.f32.vlgmr.msra.gmra.mxu1 %vm785_vm5, %v1975_v14 }
 0x3b8   :  { %2312 = vmatprep.mubr.msk.f32.mxu0 %vm785_vm5, %v1900_v15  ;;  %2390 = vmatprep.mubr.msk.f32.mxu1 %vm785_vm5, %v1976_v16 }
 0x3bb   :  { %2313 = vmatmul.mubr.msk.f32.gmra.mxu0 %vm785_vm5, %v1901_v17  ;;  %2391 = vmatmul.mubr.msk.f32.gmra.mxu1 %vm785_vm5, %v1977_v18 }
 0x3bc   :  { %2315 = vmatprep.mubr.msk.f32.mxu0 %vm785_vm5, %v1902_v19  ;;  %2393 = vmatprep.mubr.msk.f32.mxu1 %vm785_vm5, %v1978_v20 }
 0x3bf   :  { %2316 = vmatmul.mubr.msk.f32.gmra.mxu0 %vm785_vm5, %v1903_v21  ;;  %2394 = vmatmul.mubr.msk.f32.gmra.mxu1 %vm785_vm5, %v1979_v22 }
 0x3c0   :  { %2318 = vmatprep.mubr.msk.f32.mxu0 %vm785_vm5, %v1904_v23  ;;  %2396 = vmatprep.mubr.msk.f32.mxu1 %vm785_vm5, %v1980_v24 }
 0x3c3   :  { %2319 = vmatmul.mubr.msk.f32.gmra.mxu0 %vm785_vm5, %v1905_v25  ;;  %2397 = vmatmul.mubr.msk.f32.gmra.mxu1 %vm785_vm5, %v1981_v26 }
 0x3c4   :  { %2321 = vmatprep.mubr.msk.f32.mxu0 %vm785_vm5, %v1906_v27  ;;  %2399 = vmatprep.mubr.msk.f32.mxu1 %vm785_vm5, %v1982_v28 }
 0x3c7   :  { %2322 = vmatmul.mubr.msk.f32.gmra.mxu0 %vm785_vm5, %v1907_v29  ;;  %2400 = vmatmul.mubr.msk.f32.gmra.mxu1 %vm785_vm5, %v1983_v30 }
 0x3c8   :  { %2324 = vmatprep.mubr.msk.f32.mxu0 %vm785_vm5, %v1908_v31  ;;  %2402 = vmatprep.mubr.msk.f32.mxu1 %vm785_vm5, %v1984_v32 }
 0x3cb   :  { %2325 = vmatmul.mubr.msk.f32.gmra.mxu0 %vm785_vm5, %v1909_v33  ;;  %2403 = vmatmul.mubr.msk.f32.gmra.mxu1 %vm785_vm5, %v1985_v34 }
 0x3cc   :  { %2359 = vmatprep.mubr.msk.f32.mxu0 %vm785_vm5, %v1942_v35  ;;  %2405 = vmatprep.mubr.msk.f32.mxu1 %vm785_vm5, %v1986_v36 }
 0x3cf   :  { %2360 = vmatmul.mubr.msk.f32.vlgmr.msra.gmra.mxu0 %vm785_vm5, %v1943_v37  ;;  %2406 = vmatmul.mubr.msk.f32.gmra.mxu1 %vm785_vm5, %v1987_v38 }
 0x3d0   :  { %2362 = vmatprep.mubr.msk.f32.mxu0 %vm785_vm5, %v1944_v39  ;;  %2408 = vmatprep.mubr.msk.f32.mxu1 %vm785_vm5, %v1988_v40 }
 0x3d3   :  { %2363 = vmatmul.mubr.msk.f32.gmra.mxu0 %vm785_vm5, %v1945_v41  ;;  %2409 = vmatmul.mubr.msk.f32.gmra.mxu1 %vm785_vm5, %v1989_v42 }
 0x3d4   :  { %2365 = vmatprep.mubr.msk.f32.mxu0 %vm785_vm5, %v1946_v43  ;;  %v1730_v43 = vpop.permute.xlu1 %1729 }
 0x3d7   :  { %2366 = vmatmul.mubr.msk.f32.gmra.mxu0 %vm785_vm5, %v1947_v44 }
 0x3d8   :  { %2368 = vmatprep.mubr.msk.f32.mxu0 %vm785_vm5, %v1948_v45 }
 0x3db   :  { %2369 = vmatmul.mubr.msk.f32.gmra.mxu0 %vm785_vm5, %v1949_v46  ;;  %v1725_v46 = vpop.permute.xlu0 %1724 }
 0x3dc   :  { %2371 = vmatprep.mubr.msk.f32.mxu0 %vm785_vm5, %v1950_v47 }
 0x3df   :  { %2372 = vmatmul.mubr.msk.f32.gmra.mxu0 %vm785_vm5, %v1951_v48 }
 0x3e0   :  { %2374 = vmatprep.mubr.msk.f32.mxu0 %vm785_vm5, %v1952_v49 }
 0x3e3   :  { %2375 = vmatmul.mubr.msk.f32.gmra.mxu0 %vm785_vm5, %v1953_v50  ;;  %v1720_v50 = vpop.permute.xlu1 %1719 }
 0x3e4   :  { %2377 = vmatprep.mubr.msk.f32.mxu0 %vm785_vm5, %v1954_v51 }
 0x3e7   :  { %2378 = vmatmul.mubr.msk.f32.gmra.mxu0 %vm785_vm5, %v1955_v52  ;;  %v1715_v52 = vpop.permute.xlu0 %1714 }
 0x3e8   :  { %2380 = vmatprep.mubr.msk.f32.mxu0 %vm785_vm5, %v1956_v53 }
 0x3eb   :  { %2381 = vmatmul.mubr.msk.f32.gmra.mxu0 %vm785_vm5, %v1957_v54 }
 0x3ec   :  { %2443 = vmatprep.mubr.msk.f32.mxu0 %vm2455_vm1, %v3223_v0 }
 0x3fc   :  { %v3088_v55 = vpop.f32.mrf.mxu1 }
 0x3fd   :  { %3225 = vst [vmem:[#allocation2_spill] sm:$0xff] %v3088_v55 }
 0x3fe   :  { %v3090_v56 = vpop.f32.mrf.mxu1 }
 0x3ff   :  { %3226 = vst [vmem:[#allocation3_spill] sm:$0xff] %v3090_v56 }
 0x400   :  { %v3092_v57 = vpop.f32.mrf.mxu1 }
 0x402   :  { %v3094_v58 = vpop.f32.mrf.mxu1 }
 0x403   :  { %3227 = vst [vmem:[#allocation4_spill] sm:$0xff] %v3094_v58 }
 0x404   :  { %v3096_v59 = vpop.f32.mrf.mxu1 }
 0x406   :  { %v3098_v60 = vpop.f32.mrf.mxu1 }
 0x408   :  { %v3100_v61 = vpop.f32.mrf.mxu1 }
 0x40a   :  { %v3102_v62 = vpop.f32.mrf.mxu1 }
 0x40c   :  { %v3104_v63 = vpop.f32.mrf.mxu1 }
 0x40e   :  { %v3106_v1 = vpop.f32.mrf.mxu1 }
 0x410   :  { %v2348_v2 = vpop.f32.mrf.mxu1 }
 0x412   :  { %v3108_v3 = vpop.f32.mrf.mxu1 }
 0x414   :  { %v2351_v4 = vpop.f32.mrf.mxu1 }
 0x416   :  { %v1153_v5 = vpop.f32.mrf.mxu1 }
 0x418   :  { %v2354_v7 = vpop.f32.mrf.mxu1 }
 0x41a   :  { %v1163_v10 = vpop.f32.mrf.mxu1 }
 0x46f   :  { %v3110_v6 = vpop.f32.mrf.mxu0 }
 0x470   :  { %3228 = vst [vmem:[#allocation5_spill] sm:$0xff] %v3110_v6  ;;  %v1705_v6 = vpop.permute.xlu0 %1704 }
 0x471   :  { %v3112_v8 = vpop.f32.mrf.mxu0 }
 0x472   :  { %3229 = vst [vmem:[#allocation6_spill] sm:$0xff] %v3112_v8 }
 0x473   :  { %v3114_v9 = vpop.f32.mrf.mxu0 }
 0x475   :  { %v3116_v11 = vpop.f32.mrf.mxu0 }
 0x476   :  { %3230 = vst [vmem:[#allocation7_spill] sm:$0xff] %v3116_v11 }
 0x477   :  { %v3118_v12 = vpop.f32.mrf.mxu0  ;;  %v3120_v13 = vpop.f32.mrf.mxu1 }
 0x478   :  { %3231 = vst [vmem:[#allocation8_spill] sm:$0xff] %v3120_v13  ;;  %v1710_v13 = vpop.permute.xlu1 %1709 }
 0x479   :  { %v3122_v14 = vpop.f32.mrf.mxu0  ;;  %v3124_v15 = vpop.f32.mrf.mxu1 }
 0x47a   :  { %3232 = vst [vmem:[#allocation9_spill] sm:$0xff] %v3124_v15 }
 0x47b   :  { %v3126_v16 = vpop.f32.mrf.mxu0  ;;  %v3128_v17 = vpop.f32.mrf.mxu1 }
 0x47c   :  { %3233 = vst [vmem:[#allocation10_spill] sm:$0xff] %v3128_v17 }
 0x47d   :  { %v3130_v18 = vpop.f32.mrf.mxu0  ;;  %v3132_v20 = vpop.f32.mrf.mxu1 }
 0x47e   :  { %3234 = vst [vmem:[#allocation11_spill] sm:$0xff] %v3132_v20 }
 0x47f   :  { %v2317_v19 = vpop.f32.mrf.mxu0  ;;  %v3134_v23 = vpop.f32.mrf.mxu1 }
 0x480   :  { %3235 = vst [vmem:[#allocation12_spill] sm:$0xff] %v3134_v23 }
 0x481   :  { %v940_v21 = vpop.f32.mrf.mxu0  ;;  %v3136_v26 = vpop.f32.mrf.mxu1 }
 0x482   :  { %3236 = vst [vmem:[#allocation13_spill] sm:$0xff] %v3136_v26 }
 0x483   :  { %v2320_v22 = vpop.f32.mrf.mxu0  ;;  %v3138_v29 = vpop.f32.mrf.mxu1 }
 0x484   :  { %v1149_v8 = vadd.f32 %v2348_v2, %v2320_v22  ;;  %v1134_v2 = vadd.f32 %v3106_v1, %v940_v21 }
 0x485   :  { %v950_v24 = vpop.f32.mrf.mxu0  ;;  %v3142_v32 = vpop.f32.mrf.mxu1 }
 0x486   :  { %3238 = vst [vmem:[#allocation15_spill] sm:$0xff] %v3142_v32  ;;  %v1144_v23 = vadd.f32 %v3108_v3, %v950_v24  ;;  %v1695_v24 = vpop.permute.xlu0 %1694 }
 0x487   :  { %v2323_v25 = vpop.f32.mrf.mxu0  ;;  %v2401_v35 = vpop.f32.mrf.mxu1 }
 0x488   :  { %v1159_v0 = vadd.f32 %v2351_v4, %v2323_v25  ;;  %v1139_v4 = vadd.f32 %v3104_v63, %v2317_v19  ;;  %v1124_v19 = vadd.f32 %v3102_v62, %v3130_v18  ;;  %v1114_v18 = vadd.f32 %v3098_v60, %v3122_v14 }
 0x489   :  { %v960_v27 = vpop.f32.mrf.mxu0  ;;  %v3152_v38 = vpop.f32.mrf.mxu1 }
 0x48a   :  { %v1154_v20 = vadd.f32 %v1153_v5, %v960_v27  ;;  %v1685_v62 = vpop.permute.xlu0 %1684 }
 0x48b   :  { %v2326_v28 = vpop.f32.mrf.mxu0  ;;  %v2404_v41 = vpop.f32.mrf.mxu1 }
 0x48d   :  { %v970_v30 = vpop.f32.mrf.mxu0  ;;  %v1591_v45 = vpop.f32.mrf.mxu1 }
 0x48e   :  { %v1164_v26 = vadd.f32 %v1163_v10, %v970_v30  ;;  %v1119_v30 = vadd.f32 %v3096_v59, %v3118_v12  ;;  %v1109_v12 = vadd.f32 %v3092_v57, %v3114_v9 }
 0x48f   :  { %v3140_v31 = vpop.f32.mrf.mxu0  ;;  %v2407_v49 = vpop.f32.mrf.mxu1 }
 0x490   :  { %3237 = vst [vmem:[#allocation14_spill] sm:$0xff] %v3140_v31 }
 0x491   :  { %v3144_v33 = vpop.f32.mrf.mxu0  ;;  %v1601_v54 = vpop.f32.mrf.mxu1 }
 0x492   :  { %3239 = vst [vmem:[#allocation16_spill] sm:$0xff] %v3144_v33  ;;  %v1169_v33 = vadd.f32 %v2354_v7, %v2326_v28  ;;  %v1700_v28 = vpop.permute.xlu1 %1699 }
 0x493   :  { %v3146_v34 = vpop.f32.mrf.mxu0  ;;  %v2410_v56 = vpop.f32.mrf.mxu1 }
 0x494   :  { %3240 = vst [vmem:[#allocation17_spill] sm:$0xff] %v3146_v34 }
 0x495   :  { %v3148_v36 = vpop.f32.mrf.mxu0  ;;  %v1611_v25 = vpop.f32.mrf.mxu1 }
 0x496   :  { %3241 = vst [vmem:[#allocation18_spill] sm:$0xff] %v3148_v36 }
 0x497   :  { %v3150_v37 = vpop.f32.mrf.mxu0 }
 0x499   :  { %v3154_v39 = vpop.f32.mrf.mxu0 }
 0x49a   :  { %3242 = vst [vmem:[#allocation19_spill] sm:$0xff] %v3154_v39 }
 0x49b   :  { %v2370_v40 = vpop.f32.mrf.mxu0 }
 0x49d   :  { %v1339_v42 = vpop.f32.mrf.mxu0 }
 0x49f   :  { %v2373_v44 = vpop.f32.mrf.mxu0 }
 0x4a0   :  { %v1397_v10 = vadd.f32 %v2373_v44, %v1139_v4  ;;  %v3254_v4 = vld [vmem:[#allocation6_spill] sm:$0xff] }
 0x4a1   :  { %v1349_v47 = vpop.f32.mrf.mxu0 }
 0x4a2   :  { %v1629_v21 = vadd.f32 %v2401_v35, %v1397_v10 }
 0x4a3   :  { %v2376_v48 = vpop.f32.mrf.mxu0 }
 0x4a4   :  { %v1399_v58 = vadd.f32 %v2376_v48, %v1149_v8  ;;  %v1129_v8 = vadd.f32 %v3100_v61, %v3126_v16  ;;  %v1394_v61 = vadd.f32 %v1339_v42, %v1124_v19 }
 0x4a5   :  { %v1359_v51 = vpop.f32.mrf.mxu0 }
 0x4a6   :  { %v1398_v5 = vadd.f32 %v1359_v51, %v1144_v23  ;;  %v3243_v23 = vmov 0.0   ;;  %v1395_v1 = vadd.f32 %v2370_v40, %v1129_v8  ;;  %v3246_v40 = vld [vmem:[#allocation7_spill] sm:$0xff]  ;;  %v3253_v51 = vld [vmem:[#allocation13_spill] sm:$0xff] }
 0x4a7   :  { %v2379_v53 = vpop.f32.mrf.mxu0 }
 0x4a8   :  { %v1401_v17 = vadd.f32 %v2379_v53, %v1159_v0 }
 0x4a9   :  { %v1369_v15 = vpop.f32.mrf.mxu0 }
 0x4aa   :  { %v1400_v36 = vadd.f32 %v1369_v15, %v1154_v20  ;;  %v1633_v11 = vadd.f32 %v2407_v49, %v1401_v17  ;;  %v1631_v15 = vadd.f32 %v2404_v41, %v1399_v58  ;;  %v3252_v49 = vld [vmem:[#allocation18_spill] sm:$0xff] }
 0x4ab   :  { %v2382_v31 = vpop.f32.mrf.mxu0 }
 0x4ac   :  { %v1403_v55 = vadd.f32 %v2382_v31, %v1169_v33  ;;  %v1632_v7 = vadd.f32 %v1601_v54, %v1400_v36  ;;  %v1745_v20 = vadd.f32 %v1720_v50, %v1633_v11  ;;  %v1743_v58 = vadd.f32 %v1710_v13, %v1631_v15  ;;  %v3245_v36 = vld [vmem:[#allocation15_spill] sm:$0xff] }
 0x4ad   :  { %v1379_v34 = vpop.f32.mrf.mxu0  ;;  %v1393_v13 = vadd.f32 %v3150_v37, %v1119_v30  ;;  %v1627_v33 = vadd.f32 %v3138_v29, %v1395_v1  ;;  %v3247_v37 = vld [vmem:[#allocation4_spill] sm:$0xff]  ;;  %v3248_v29 = vld [vmem:[#allocation17_spill] sm:$0xff] }
 0x4ae   :  { %v1402_v32 = vadd.f32 %v1379_v34, %v1164_v26  ;;  %v1635_v39 = vadd.f32 %v2410_v56, %v1403_v55  ;;  %v1396_v55 = vadd.f32 %v1349_v47, %v1134_v2  ;;  %v1630_v56 = vadd.f32 %v1591_v45, %v1398_v5  ;;  %v1690_v26 = vpop.permute.xlu1 %1689  ;;  %v1675_v45 = vpop.permute.xlu0 %1674  ;;  %v3251_v47 = vld [vmem:[#allocation2_spill] sm:$0xff] }
 0x4af   :  { %v1744_v63 = vadd.f32 %v1715_v52, %v1632_v7  ;;  %v1761_v11 = vmax.f32 %v1745_v20, 0.0  ;;  %v1741_v34 = vadd.f32 %v1700_v28, %v1629_v21  ;;  %v1759_v59 = vmax.f32 %v1743_v58, 0.0  ;;  %v3256_v7 = vld [vmem:[#allocation14_spill] sm:$0xff]  ;;  %v3258_v20 = vld [vmem:[#allocation16_spill] sm:$0xff]  ;;  %v3261_v21 = vld [vmem:[#allocation9_spill] sm:$0xff] }
 0x4b0   :  { %v1747_v0 = vadd.f32 %v1730_v43, %v1635_v39  ;;  %v1634_v27 = vadd.f32 %v1611_v25, %v1402_v32  ;;  %v1628_v16 = vadd.f32 %v3152_v38, %v1396_v55  ;;  %v1742_v31 = vadd.f32 %v1705_v6, %v1630_v56  ;;  %v3244_v6 = vld [vmem:[#allocation19_spill] sm:$0xff]  ;;  %v3249_v43 = vld [vmem:[#allocation12_spill] sm:$0xff] }
 0x4b1   :  { %v1760_v32 = vmax.f32 %v1744_v63, 0.0  ;;  %v1392_v35 = vadd.f32 %v3244_v6, %v1114_v18  ;;  %v1626_v38 = vadd.f32 %v3245_v36, %v1394_v61  ;;  %v1104_v41 = vadd.f32 %v3247_v37, %v3246_v40  ;;  %v3255_v25 = vld [vmem:[#allocation3_spill] sm:$0xff]  ;;  %v3260_v63 = vld [vmem:[#allocation8_spill] sm:$0xff] }
 0x4b2   :  { %v1763_v22 = vmax.f32 %v1747_v0, 0.0  ;;  %v1746_v3 = vadd.f32 %v1725_v46, %v1634_v27  ;;  %v1740_v39 = vadd.f32 %v1695_v24, %v1628_v16  ;;  %v1758_v60 = vmax.f32 %v1742_v31, 0.0  ;;  %v1680_v14 = vpop.permute.xlu1 %1679  ;;  %v3250_v46 = vld [vmem:[#allocation5_spill] sm:$0xff]  ;;  %v3257_v27 = vld [vmem:[#allocation10_spill] sm:$0xff]  ;;  %v1665_v56 = vpop.permute.xlu0 %1664 }
 0x4b3   :  { %v1391_v42 = vadd.f32 %v3248_v29, %v1109_v12  ;;  %v1625_v44 = vadd.f32 %v3249_v43, %v1393_v13  ;;  %v1739_v57 = vadd.f32 %v1690_v26, %v1627_v33  ;;  %v1757_v9 = vmax.f32 %v1741_v34, 0.0  ;;  %v1764_v33 = vld [vmem:[%s3221_s9] sm:$0xff] }
 0x4b4   :  { %v1762_v17 = vmax.f32 %v1746_v3, 0.0  ;;  %2412 = vmatpush3.msra.mxu0 %v1763_v22  ;;  %v1099_v48 = vadd.f32 %v3251_v47, %v3250_v46  ;;  %v1390_v50 = vadd.f32 %v3252_v49, %v1104_v41  ;;  %v1624_v52 = vadd.f32 %v3253_v51, %v1392_v35  ;;  %v3259_v3 = vld [vmem:[#allocation11_spill] sm:$0xff] }
 0x4b5   :  { %2413 = vmatprep.subr.mxu0 %v3243_v23  ;;  %v1738_v53 = vadd.f32 %v1685_v62, %v1626_v38  ;;  %v1756_v54 = vmax.f32 %v1740_v39, 0.0  ;;  %v1094_v5 = vadd.f32 %v3255_v25, %v3254_v4  ;;  %v1623_v28 = vadd.f32 %v3257_v27, %v1391_v42 }
 0x4b6   :  { %2414 = vmatpush3.msra.mxu0 %v1762_v17  ;;  %v1389_v0 = vadd.f32 %v3256_v7, %v1099_v48  ;;  %v1737_v2 = vadd.f32 %v1680_v14, %v1625_v44  ;;  %v1755_v10 = vmax.f32 %v1739_v57, 0.0  ;;  %v1670_v15 = vpop.permute.xlu1 %1669  ;;  %v1622_v24 = vadd.f32 %v3259_v3, %v1390_v50  ;;  %v1655_v31 = vpop.permute.xlu0 %1654 }
 0x4b7   :  { %2415 = vmatprep.subr.mxu0 %v3243_v23  ;;  %v1388_v22 = vadd.f32 %v3258_v20, %v1094_v5  ;;  %v1736_v8 = vadd.f32 %v1675_v45, %v1624_v52  ;;  %v1754_v55 = vmax.f32 %v1738_v53, 0.0  ;;  %v1735_v19 = vadd.f32 %v1670_v15, %v1623_v28 }
 0x4b8   :  { %2416 = vmatpush3.msra.mxu0 %v1761_v11  ;;  %v1621_v17 = vadd.f32 %v3260_v63, %v1389_v0  ;;  %v1753_v1 = vmax.f32 %v1737_v2, 0.0  ;;  %v1734_v11 = vadd.f32 %v1665_v56, %v1622_v24 }
 0x4b9   :  { %2417 = vmatprep.subr.mxu0 %v3243_v23  ;;  %v1620_v58 = vadd.f32 %v3261_v21, %v1388_v22  ;;  %v1752_v26 = vmax.f32 %v1736_v8, 0.0  ;;  %v1751_v16 = vmax.f32 %v1735_v19, 0.0 }
 0x4ba   :  { %2418 = vmatpush3.msra.mxu0 %v1760_v32  ;;  %v1660_v30 = vpop.permute.xlu1 %1659  ;;  %v1750_v62 = vmax.f32 %v1734_v11, 0.0 }
 0x4bb   :  { %2419 = vmatprep.subr.mxu0 %v3243_v23  ;;  %v1733_v61 = vadd.f32 %v1660_v30, %v1621_v17  ;;  %v1732_v32 = vadd.f32 %v1655_v31, %v1620_v58 }
 0x4bc   :  { %2420 = vmatpush3.msra.mxu0 %v1759_v59 }
 0x4bd   :  { %2421 = vmatprep.subr.mxu0 %v3243_v23  ;;  %v1749_v18 = vmax.f32 %v1733_v61, 0.0  ;;  %v1748_v13 = vmax.f32 %v1732_v32, 0.0 }
 0x4be   :  { %2422 = vmatpush3.msra.mxu0 %v1758_v60  ;;  %v1769_v34 = vpop.permute.xlu1 %1768 }
 0x4bf   :  { %2423 = vmatprep.subr.mxu0 %v3243_v23 }
 0x4c0   :  { %2424 = vmatpush3.msra.mxu0 %v1757_v9 }
 0x4c1   :  { %2425 = vmatprep.subr.mxu0 %v3243_v23 }
 0x4c2   :  { %2426 = vmatpush3.msra.mxu0 %v1756_v54 }
 0x4c3   :  { %2427 = vmatprep.subr.mxu0 %v3243_v23 }
 0x4c4   :  { %2428 = vmatpush3.msra.mxu0 %v1755_v10 }
 0x4c5   :  { %2429 = vmatprep.subr.mxu0 %v3243_v23 }
 0x4c6   :  { %2430 = vmatpush3.msra.mxu0 %v1754_v55 }
 0x4c7   :  { %2431 = vmatprep.subr.mxu0 %v3243_v23 }
 0x4c8   :  { %2432 = vmatpush3.msra.mxu0 %v1753_v1 }
 0x4c9   :  { %2433 = vmatprep.subr.mxu0 %v3243_v23 }
 0x4ca   :  { %2434 = vmatpush3.msra.mxu0 %v1752_v26 }
 0x4cb   :  { %2435 = vmatprep.subr.mxu0 %v3243_v23 }
 0x4cc   :  { %2436 = vmatpush3.msra.mxu0 %v1751_v16 }
 0x4cd   :  { %2437 = vmatprep.subr.mxu0 %v3243_v23 }
 0x4ce   :  { %2438 = vmatpush3.msra.mxu0 %v1750_v62 }
 0x4cf   :  { %2439 = vmatprep.subr.mxu0 %v3243_v23 }
 0x4d0   :  { %2440 = vmatpush3.msra.mxu0 %v1749_v18 }
 0x4d1   :  { %2441 = vmatprep.subr.mxu0 %v3243_v23 }
 0x4d2   :  { %2442 = vmatpush3.msra.mxu0 %v1748_v13 }
 0x4d3   :  { %2444 = vmatmul.mubr.f32.vlgmr.msra.gmra.mxu0 %v1764_v33 }
 0x593   :  { %v1837_v59 = vpop.f32.mrf.mxu0 }
 0x594   :  { %v1838_v12 = vadd.f32 %v1837_v59, %v1769_v34 }
 0x595   :  { %v2445_v6 = vpop.f32.mrf.mxu0 }
 0x596   :  { %1842 = vst.msk [vmem:[%s3222_s11] sm:$0xff] %vm1841_vm6, %v1838_v12 }

</bundles_post_ra>
